<compile_context>
chip_gen: v5e
topology: v5e:2x2
jax: 0.10.0
libtpu: 0.0.40
codegen_flags: <defaults>
</compile_context>

<pallas_src>
import math
import functools

import jax
import jax.numpy as jnp
from jax.experimental import pallas as pl
from jax.experimental.pallas import tpu as pltpu

EPS = 1e-5


def _round_up(x, m):
    return ((x + m - 1) // m) * m


def _pick_tn(n):
    """Output-channel tile: multiple of 128 dividing n, <= 512, prefer >= 2 blocks."""
    if n % 128 != 0:
        return n
    best = None
    for t in range(min(n, 512), 0, -128):
        if n % t == 0:
            if best is None:
                best = t
            if n // t >= 2:
                return t
    return best if best is not None else n


def _pick_rows(mp):
    """Row tile for flattened (M, C) elementwise kernels (multiple of 8, divides mp)."""
    if mp <= 32:
        return mp
    cap = min(mp // 2, 1024)
    cap -= cap % 8
    for t in range(cap, 7, -8):
        if mp % t == 0:
            return t
    return mp


def _pick_tile(hw):
    """Spatial tile for the per-sample (N, HW, C) IBN kernel."""
    for d in range(min(hw, 512), 0, -1):
        if hw % d == 0 and (d % 8 == 0 or d == hw):
            return d
    return hw


# ------------------- Pallas conv matmul with fused per-(n,c) moments -------------------
# grid = (Nout//tn [parallel], Mp//tm [arbitrary, innermost]); K collapsed (fits VMEM).
# sel is a (nbp, Mp) one-hot batch selector so s/q = sel @ out / sel @ out^2 give the
# per-(n, c) sums needed by BatchNorm / InstanceNorm without re-reading the output.
def _conv_mm_kernel(a_ref, b_ref, sel_ref, o_ref, s_ref, q_ref, s_acc, q_acc):
    i = pl.program_id(1)
    out = jnp.dot(a_ref[...], b_ref[...], preferred_element_type=jnp.float32)
    o_ref[...] = out

    @pl.when(i == 0)
    def _():
        s_acc[...] = jnp.zeros_like(s_acc)
        q_acc[...] = jnp.zeros_like(q_acc)

    sel = sel_ref[...]
    s_acc[...] += jnp.dot(sel, out, preferred_element_type=jnp.float32)
    q_acc[...] += jnp.dot(sel, out * out, preferred_element_type=jnp.float32)

    @pl.when(i == pl.num_programs(1) - 1)
    def _():
        s_ref[...] = s_acc[...]
        q_ref[...] = q_acc[...]


@functools.lru_cache(maxsize=None)
def _conv_mm_call(Mp, Kp, Nout, tm, tn, nbp):
    return pl.pallas_call(
        _conv_mm_kernel,
        out_shape=(jax.ShapeDtypeStruct((Mp, Nout), jnp.float32),
                   jax.ShapeDtypeStruct((nbp, Nout), jnp.float32),
                   jax.ShapeDtypeStruct((nbp, Nout), jnp.float32)),
        grid_spec=pltpu.PrefetchScalarGridSpec(
            num_scalar_prefetch=0,
            grid=(Nout // tn, Mp // tm),
            in_specs=[pl.BlockSpec((tm, Kp), lambda j, i: (i, 0)),
                      pl.BlockSpec((Kp, tn), lambda j, i: (0, j)),
                      pl.BlockSpec((nbp, tm), lambda j, i: (0, i))],
            out_specs=(pl.BlockSpec((tm, tn), lambda j, i: (i, j)),
                       pl.BlockSpec((nbp, tn), lambda j, i: (0, j)),
                       pl.BlockSpec((nbp, tn), lambda j, i: (0, j))),
            scratch_shapes=[pltpu.VMEM((nbp, tn), jnp.float32),
                            pltpu.VMEM((nbp, tn), jnp.float32)]),
        compiler_params=pltpu.CompilerParams(
            dimension_semantics=("parallel", "arbitrary")))


def pallas_conv_mm(a_bf16, b_bf16, nb, hw):
    """a: (M, K) bf16 patches, b: (K, Nout) bf16 weights. Returns (out f32, s, q)."""
    M, K = a_bf16.shape
    _, Nout = b_bf16.shape
    if M > 256:
        tm = 256
        Mp = _round_up(M, 256)
    else:
        Mp = _round_up(M, 8)
        tm = Mp
    tn = _pick_tn(Nout)
    Kp = _round_up(K, 128)
    a = jnp.pad(a_bf16, ((0, Mp - M), (0, Kp - K))) if (Mp != M or Kp != K) else a_bf16
    b = jnp.pad(b_bf16, ((0, Kp - K), (0, 0))) if Kp != K else b_bf16
    nbp = _round_up(nb, 8)
    rows = jnp.arange(Mp, dtype=jnp.int32) // hw          # padded rows map to >= nb
    sel = (rows[None, :] == jnp.arange(nbp, dtype=jnp.int32)[:, None]).astype(jnp.float32)
    out, s, q = _conv_mm_call(Mp, Kp, Nout, tm, tn, nbp)(a, b, sel)
    if Mp != M:
        out = out[:M]
    return out, s[:nb], q[:nb]


# ----------------- Pallas fused affine kernels (BN / IBN / residual / relu) -----------------
def _make_affine_flat_kernel(relu, res_mode):
    # res_mode: 0 = no residual, 1 = plain residual, 2 = residual with its own BN affine
    def kern(*refs):
        if res_mode == 0:
            x_ref, s_ref, b_ref, o_ref = refs
            y = x_ref[...] * s_ref[...] + b_ref[...]
        elif res_mode == 1:
            x_ref, s_ref, b_ref, r_ref, o_ref = refs
            y = x_ref[...] * s_ref[...] + b_ref[...] + r_ref[...]
        else:
            x_ref, s_ref, b_ref, r_ref, rs_ref, rb_ref, o_ref = refs
            y = (x_ref[...] * s_ref[...] + b_ref[...]
                 + r_ref[...] * rs_ref[...] + rb_ref[...])
        if relu:
            y = jnp.maximum(y, 0.0)
        o_ref[...] = y
    return kern


@functools.lru_cache(maxsize=None)
def _affine_flat_call(Mp, C, tm, relu, res_mode):
    kern = _make_affine_flat_kernel(relu, res_mode)
    in_specs = [pl.BlockSpec((tm, C), lambda t: (t, 0)),
                pl.BlockSpec((1, C), lambda t: (0, 0)),
                pl.BlockSpec((1, C), lambda t: (0, 0))]
    if res_mode >= 1:
        in_specs.append(pl.BlockSpec((tm, C), lambda t: (t, 0)))
    if res_mode == 2:
        in_specs.append(pl.BlockSpec((1, C), lambda t: (0, 0)))
        in_specs.append(pl.BlockSpec((1, C), lambda t: (0, 0)))
    return pl.pallas_call(
        kern,
        out_shape=jax.ShapeDtypeStruct((Mp, C), jnp.float32),
        grid_spec=pltpu.PrefetchScalarGridSpec(
            num_scalar_prefetch=0,
            grid=(Mp // tm,),
            in_specs=in_specs,
            out_specs=pl.BlockSpec((tm, C), lambda t: (t, 0))),
        compiler_params=pltpu.CompilerParams(dimension_semantics=("parallel",)))


def apply_affine_flat(x, scale_c, offset_c, relu=False,
                      residual=None, res_scale=None, res_offset=None):
    """y = relu?(x*scale + offset [+ residual[*res_scale + res_offset]]); per-channel."""
    N, H, W, C = x.shape
    M = N * H * W
    Mp = _round_up(M, 8)
    x2 = x.reshape(M, C)
    if Mp != M:
        x2 = jnp.pad(x2, ((0, Mp - M), (0, 0)))
    tm = _pick_rows(Mp)
    args = [x2, scale_c.reshape(1, C), offset_c.reshape(1, C)]
    res_mode = 0
    if residual is not None:
        r2 = residual.reshape(M, C)
        if Mp != M:
            r2 = jnp.pad(r2, ((0, Mp - M), (0, 0)))
        args.append(r2)
        if res_scale is not None:
            args.append(res_scale.reshape(1, C))
            args.append(res_offset.reshape(1, C))
            res_mode = 2
        else:
            res_mode = 1
    out = _affine_flat_call(Mp, C, tm, relu, res_mode)(*args)
    if Mp != M:
        out = out[:M]
    return out.reshape(N, H, W, C)


def _ibn_affine_kernel(x_ref, s_ref, b_ref, o_ref):
    y = x_ref[...] * s_ref[...][:, None, :] + b_ref[...][:, None, :]
    o_ref[...] = jnp.maximum(y, 0.0)


@functools.lru_cache(maxsize=None)
def _ibn_affine_call(N, HW, C, th):
    return pl.pallas_call(
        _ibn_affine_kernel,
        out_shape=jax.ShapeDtypeStruct((N, HW, C), jnp.float32),
        grid_spec=pltpu.PrefetchScalarGridSpec(
            num_scalar_prefetch=0,
            grid=(HW // th,),
            in_specs=[pl.BlockSpec((N, th, C), lambda t: (0, t, 0)),
                      pl.BlockSpec((N, C), lambda t: (0, 0)),
                      pl.BlockSpec((N, C), lambda t: (0, 0))],
            out_specs=pl.BlockSpec((N, th, C), lambda t: (0, t, 0))),
        compiler_params=pltpu.CompilerParams(dimension_semantics=("parallel",)))


# ------------------------------- Pallas max-pool kernel -------------------------------
def _maxpool_kernel(x_ref, o_ref):
    x = x_ref[...]                       # (9, tm, C)
    o = x[0]
    for k in range(1, x.shape[0]):
        o = jnp.maximum(o, x[k])
    o_ref[...] = o


@functools.lru_cache(maxsize=None)
def _maxpool_call(M, C, tm):
    return pl.pallas_call(
        _maxpool_kernel,
        out_shape=jax.ShapeDtypeStruct((M, C), jnp.float32),
        grid_spec=pltpu.PrefetchScalarGridSpec(
            num_scalar_prefetch=0,
            grid=(M // tm,),
            in_specs=[pl.BlockSpec((9, tm, C), lambda t: (0, t, 0))],
            out_specs=pl.BlockSpec((tm, C), lambda t: (t, 0))),
        compiler_params=pltpu.CompilerParams(dimension_semantics=("parallel",)))


def maxpool3x3s2(x):
    N, H, W, C = x.shape
    xp = jnp.pad(x, ((0, 0), (1, 1), (1, 1), (0, 0)), constant_values=-jnp.inf)
    Ho = (H + 2 - 3) // 2 + 1
    Wo = (W + 2 - 3) // 2 + 1
    M = N * Ho * Wo
    # TODO(synk): 9-tap patch extraction is still materialized in XLA (small, one-time).
    cols = [xp[:, i:i + 2 * Ho:2, j:j + 2 * Wo:2, :].reshape(M, C)
            for i in range(3) for j in range(3)]
    patches = jnp.stack(cols, axis=0)            # (9, M, C)
    tm = _pick_rows(M)
    out = _maxpool_call(M, C, tm)(patches)
    return out.reshape(N, Ho, Wo, C)


# -------------------------------------- ops (glue) --------------------------------------
def conv2d(x, w, stride=1, padding=0):
    """x: NHWC f32, w: (kh, kw, cin, cout). Returns (out NHWC f32, s (N,cout), q (N,cout)).

    im2col in JAX (bf16), matmul + fused per-(n,c) sum/sumsq moments in Pallas."""
    kh, kw, cin, cout = w.shape
    N = x.shape[0]
    xb = x.astype(jnp.bfloat16)
    if kh == 1 and kw == 1 and padding == 0:
        if stride > 1:
            xb = xb[:, ::stride, ::stride, :]
        _, Ho, Wo, _ = xb.shape
        patches = xb.reshape(N * Ho * Wo, cin)
    else:
        xp = jnp.pad(xb, ((0, 0), (padding, padding), (padding, padding), (0, 0)))
        Hp, Wp = xp.shape[1], xp.shape[2]
        Ho = (Hp - kh) // stride + 1
        Wo = (Wp - kw) // stride + 1
        cols = []
        for i in range(kh):
            for j in range(kw):
                cols.append(xp[:, i:i + stride * Ho:stride, j:j + stride * Wo:stride, :])
        patches = jnp.concatenate(cols, axis=-1).reshape(N * Ho * Wo, kh * kw * cin)
    wb = w.reshape(kh * kw * cin, cout).astype(jnp.bfloat16)
    out2, s, q = pallas_conv_mm(patches, wb, N, Ho * Wo)
    return out2.reshape(N, Ho, Wo, cout), s, q


def _bn_params(s, q, cnt, gamma, beta):
    """Per-channel scale/offset from fused per-(n,c) sums (train-mode biased var)."""
    mean = jnp.sum(s, axis=0) / cnt
    var = jnp.maximum(jnp.sum(q, axis=0) / cnt - mean * mean, 0.0)
    scale = gamma * jax.lax.rsqrt(var + EPS)
    offset = beta - mean * scale
    return scale, offset


def ibn_affine(x, s, q, in_g, in_b, bn_g, bn_b):
    """IBN-a: InstanceNorm on first half channels, BatchNorm on the rest (fused affine)."""
    N, H, W, C = x.shape
    HW = H * W
    half = in_g.shape[0]
    # instance-norm stats (per n, per c)
    mean_i = s[:, :half] / HW
    var_i = jnp.maximum(q[:, :half] / HW - mean_i * mean_i, 0.0)
    scale_i = in_g[None, :] * jax.lax.rsqrt(var_i + EPS)
    off_i = in_b[None, :] - mean_i * scale_i
    # batch-norm stats (per c)
    cnt = N * HW
    mean_b = jnp.sum(s[:, half:], axis=0) / cnt
    var_b = jnp.maximum(jnp.sum(q[:, half:], axis=0) / cnt - mean_b * mean_b, 0.0)
    scale_b = bn_g * jax.lax.rsqrt(var_b + EPS)
    off_b = bn_b - mean_b * scale_b
    scale = jnp.concatenate([scale_i, jnp.broadcast_to(scale_b, (N, C - half))], axis=1)
    offset = jnp.concatenate([off_i, jnp.broadcast_to(off_b, (N, C - half))], axis=1)
    th = _pick_tile(HW)
    out = _ibn_affine_call(N, HW, C, th)(x.reshape(N, HW, C), scale, offset)
    return out.reshape(N, H, W, C)


def bottleneck(x, p):
    stride = p['stride']
    out, s1, q1 = conv2d(x, p['conv1_w'])                               # 1x1
    out = ibn_affine(out, s1, q1, p['in1_g'], p['in1_b'], p['bn1_g'], p['bn1_b'])
    out, s2, q2 = conv2d(out, p['conv2_w'], stride=stride, padding=1)   # 3x3
    cnt2 = out.shape[0] * out.shape[1] * out.shape[2]
    sc2, of2 = _bn_params(s2, q2, cnt2, p['bn2_g'], p['bn2_b'])
    out = apply_affine_flat(out, sc2, of2, relu=True)
    out, s3, q3 = conv2d(out, p['conv3_w'])                             # 1x1
    cnt3 = out.shape[0] * out.shape[1] * out.shape[2]
    sc3, of3 = _bn_params(s3, q3, cnt3, p['bn3_g'], p['bn3_b'])
    if 'ds_w' in p:
        res, sr, qr = conv2d(x, p['ds_w'], stride=stride)
        scr, ofr = _bn_params(sr, qr, cnt3, p['ds_g'], p['ds_b'])
        # bn3 + downsample-BN + residual add + relu fused in one Pallas kernel
        out = apply_affine_flat(out, sc3, of3, relu=True,
                                residual=res, res_scale=scr, res_offset=ofr)
    else:
        # bn3 + residual add + relu fused in one Pallas kernel
        out = apply_affine_flat(out, sc3, of3, relu=True, residual=x)
    return out


# ------------------------------- parameter initialization -------------------------------
def _conv_w(key, kh, kw, cin, cout):
    n = kh * kw * cout
    return jax.random.normal(key, (kh, kw, cin, cout), jnp.float32) * math.sqrt(2.0 / n)


def init_params(key):
    kit = iter(jax.random.split(key, 128))
    params = {
        'stem_w': _conv_w(next(kit), 7, 7, 3, 64),
        'stem_g': jnp.ones((64,), jnp.float32),
        'stem_b': jnp.zeros((64,), jnp.float32),
    }
    layers = []
    inplanes = 64
    # ResNet50 layers [3, 4, 6] (layer4 is dropped by base_branches: children()[:-3])
    for planes, nblocks, stride in [(64, 3, 1), (128, 4, 2), (256, 6, 2)]:
        blocks = []
        for bi in range(nblocks):
            s = stride if bi == 0 else 1
            half = planes // 2
            blk = {
                'stride': s,
                'conv1_w': _conv_w(next(kit), 1, 1, inplanes, planes),
                'in1_g': jnp.ones((half,), jnp.float32),
                'in1_b': jnp.zeros((half,), jnp.float32),
                'bn1_g': jnp.ones((planes - half,), jnp.float32),
                'bn1_b': jnp.zeros((planes - half,), jnp.float32),
                'conv2_w': _conv_w(next(kit), 3, 3, planes, planes),
                'bn2_g': jnp.ones((planes,), jnp.float32),
                'bn2_b': jnp.zeros((planes,), jnp.float32),
                'conv3_w': _conv_w(next(kit), 1, 1, planes, planes * 4),
                'bn3_g': jnp.ones((planes * 4,), jnp.float32),
                'bn3_b': jnp.zeros((planes * 4,), jnp.float32),
            }
            if bi == 0 and (s != 1 or inplanes != planes * 4):
                blk['ds_w'] = _conv_w(next(kit), 1, 1, inplanes, planes * 4)
                blk['ds_g'] = jnp.ones((planes * 4,), jnp.float32)
                blk['ds_b'] = jnp.zeros((planes * 4,), jnp.float32)
            blocks.append(blk)
            inplanes = planes * 4
        layers.append(blocks)
    params['layers'] = layers
    return params


# -------------------------------------- forward --------------------------------------
def base_branches_forward(params, x_nchw):
    x = jnp.transpose(x_nchw, (0, 2, 3, 1)).astype(jnp.float32)   # NCHW -> NHWC
    x, s0, q0 = conv2d(x, params['stem_w'], stride=2, padding=3)
    cnt0 = x.shape[0] * x.shape[1] * x.shape[2]
    sc0, of0 = _bn_params(s0, q0, cnt0, params['stem_g'], params['stem_b'])
    x = apply_affine_flat(x, sc0, of0, relu=True)
    x = maxpool3x3s2(x)
    for blocks in params['layers']:
        for blk in blocks:
            x = bottleneck(x, blk)
    return jnp.transpose(x, (0, 3, 1, 2))                          # NHWC -> NCHW


if __name__ == "__main__":
    key = jax.random.PRNGKey(0)
    pkey, xkey = jax.random.split(key)
    params = init_params(pkey)
    x = jax.random.normal(xkey, (2, 3, 32, 32), jnp.float32)       # NCHW input
    out = base_branches_forward(params, x)
    out = jax.block_until_ready(out)
    # 32 -> conv1/2 -> 16 -> maxpool -> 8 -> layer2 -> 4 -> layer3 -> 2 ; C = 256*4
    assert out.shape == (2, 1024, 2, 2), out.shape
    assert bool(jnp.all(jnp.isfinite(out)))
    print("KERNEL_OK")
</pallas_src>

<mosaic_0001>
module attributes {stable_mosaic.version = 11 : i64} {
  func.func @_conv_mm_kernel(%arg0: i32, %arg1: i32, %arg2: memref<256x256xbf16, #tpu.memory_space<vmem>>, %arg3: memref<256x64xbf16, #tpu.memory_space<vmem>>, %arg4: memref<8x256xf32, #tpu.memory_space<vmem>>, %arg5: memref<256x64xf32, #tpu.memory_space<vmem>>, %arg6: memref<8x64xf32, #tpu.memory_space<vmem>>, %arg7: memref<8x64xf32, #tpu.memory_space<vmem>>, %arg8: memref<8x64xf32, #tpu.memory_space<vmem>>, %arg9: memref<8x64xf32, #tpu.memory_space<vmem>>) attributes {dimension_semantics = [#tpu.dimension_semantics<parallel>, #tpu.dimension_semantics<arbitrary>], iteration_bounds = array<i64: 1, 2>, scalar_prefetch = 0 : i64, scratch_operands = 2 : i64, tpu.core_type = #tpu.core_type<tc>, window_params = [{transform_indices = @transform_0, window_bounds = array<i64: 256, 256>}, {transform_indices = @transform_1, window_bounds = array<i64: 256, 64>}, {transform_indices = @transform_2, window_bounds = array<i64: 8, 256>}, {transform_indices = @transform_3, window_bounds = array<i64: 256, 64>}, {transform_indices = @transform_4, window_bounds = array<i64: 8, 64>}, {transform_indices = @transform_5, window_bounds = array<i64: 8, 64>}]} {
    %c0 = arith.constant 0 : index
    %c0_0 = arith.constant 0 : index
    %0 = vector.load %arg2[%c0, %c0_0] : memref<256x256xbf16, #tpu.memory_space<vmem>>, vector<256x256xbf16>
    %c0_1 = arith.constant 0 : index
    %c0_2 = arith.constant 0 : index
    %1 = vector.load %arg3[%c0_1, %c0_2] : memref<256x64xbf16, #tpu.memory_space<vmem>>, vector<256x64xbf16>
    %cst = arith.constant dense<0.000000e+00> : vector<256x64xf32>
    %2 = tpu.matmul %0, %1, %cst {dimension_numbers = #tpu.dot_dimension_numbers<[1], [0], [0], [1], [0, 0, 1, 1], [], []>} : vector<256x256xbf16>, vector<256x64xbf16>, vector<256x64xf32> -> vector<256x64xf32>
    %c0_3 = arith.constant 0 : index
    %c0_4 = arith.constant 0 : index
    %3 = vector.load %arg5[%c0_3, %c0_4] : memref<256x64xf32, #tpu.memory_space<vmem>>, vector<256x64xf32>
    tpu.vector_store %arg5[%c0_3, %c0_4], %2 {strides = array<i32>} : memref<256x64xf32, #tpu.memory_space<vmem>>, vector<256x64xf32>,
    %c0_i32 = arith.constant 0 : i32
    %4 = arith.cmpi eq, %arg1, %c0_i32 : i32
    %5 = arith.extui %4 : i1 to i32
    %c0_i32_5 = arith.constant 0 : i32
    %6 = arith.cmpi ne, %5, %c0_i32_5 : i32
    scf.if %6 {
      %cst_19 = arith.constant 0.000000e+00 : f32
      %20 = vector.broadcast %cst_19 : f32 to vector<8x64xf32>
      %c0_20 = arith.constant 0 : index
      %c0_21 = arith.constant 0 : index
      %21 = vector.load %arg8[%c0_20, %c0_21] : memref<8x64xf32, #tpu.memory_space<vmem>>, vector<8x64xf32>
      tpu.vector_store %arg8[%c0_20, %c0_21], %20 {strides = array<i32>} : memref<8x64xf32, #tpu.memory_space<vmem>>, vector<8x64xf32>,
      %cst_22 = arith.constant 0.000000e+00 : f32
      %22 = vector.broadcast %cst_22 : f32 to vector<8x64xf32>
      %c0_23 = arith.constant 0 : index
      %c0_24 = arith.constant 0 : index
      %23 = vector.load %arg9[%c0_23, %c0_24] : memref<8x64xf32, #tpu.memory_space<vmem>>, vector<8x64xf32>
      tpu.vector_store %arg9[%c0_23, %c0_24], %22 {strides = array<i32>} : memref<8x64xf32, #tpu.memory_space<vmem>>, vector<8x64xf32>,
    } else {
    }
    %c0_6 = arith.constant 0 : index
    %c0_7 = arith.constant 0 : index
    %7 = vector.load %arg4[%c0_6, %c0_7] : memref<8x256xf32, #tpu.memory_space<vmem>>, vector<8x256xf32>
    %c0_8 = arith.constant 0 : index
    %c0_9 = arith.constant 0 : index
    %8 = vector.load %arg8[%c0_8, %c0_9] : memref<8x64xf32, #tpu.memory_space<vmem>>, vector<8x64xf32>
    %cst_10 = arith.constant dense<0.000000e+00> : vector<8x64xf32>
    %9 = tpu.matmul %7, %2, %cst_10 {dimension_numbers = #tpu.dot_dimension_numbers<[1], [0], [0], [1], [0, 0, 1, 1], [], []>} : vector<8x256xf32>, vector<256x64xf32>, vector<8x64xf32> -> vector<8x64xf32>
    %10 = arith.addf %8, %9 : vector<8x64xf32>
    %c0_11 = arith.constant 0 : index
    %c0_12 = arith.constant 0 : index
    %11 = vector.load %arg8[%c0_11, %c0_12] : memref<8x64xf32, #tpu.memory_space<vmem>>, vector<8x64xf32>
    tpu.vector_store %arg8[%c0_11, %c0_12], %10 {strides = array<i32>} : memref<8x64xf32, #tpu.memory_space<vmem>>, vector<8x64xf32>,
    %c0_13 = arith.constant 0 : index
    %c0_14 = arith.constant 0 : index
    %12 = vector.load %arg9[%c0_13, %c0_14] : memref<8x64xf32, #tpu.memory_space<vmem>>, vector<8x64xf32>
    %13 = arith.mulf %2, %2 : vector<256x64xf32>
    %cst_15 = arith.constant dense<0.000000e+00> : vector<8x64xf32>
    %14 = tpu.matmul %7, %13, %cst_15 {dimension_numbers = #tpu.dot_dimension_numbers<[1], [0], [0], [1], [0, 0, 1, 1], [], []>} : vector<8x256xf32>, vector<256x64xf32>, vector<8x64xf32> -> vector<8x64xf32>
    %15 = arith.addf %12, %14 : vector<8x64xf32>
    %c0_16 = arith.constant 0 : index
    %c0_17 = arith.constant 0 : index
    %16 = vector.load %arg9[%c0_16, %c0_17] : memref<8x64xf32, #tpu.memory_space<vmem>>, vector<8x64xf32>
    tpu.vector_store %arg9[%c0_16, %c0_17], %15 {strides = array<i32>} : memref<8x64xf32, #tpu.memory_space<vmem>>, vector<8x64xf32>,
    %c1_i32 = arith.constant 1 : i32
    %17 = arith.cmpi eq, %arg1, %c1_i32 : i32
    %18 = arith.extui %17 : i1 to i32
    %c0_i32_18 = arith.constant 0 : i32
    %19 = arith.cmpi ne, %18, %c0_i32_18 : i32
    scf.if %19 {
      %c0_19 = arith.constant 0 : index
      %c0_20 = arith.constant 0 : index
      %20 = vector.load %arg8[%c0_19, %c0_20] : memref<8x64xf32, #tpu.memory_space<vmem>>, vector<8x64xf32>
      %c0_21 = arith.constant 0 : index
      %c0_22 = arith.constant 0 : index
      %21 = vector.load %arg6[%c0_21, %c0_22] : memref<8x64xf32, #tpu.memory_space<vmem>>, vector<8x64xf32>
      tpu.vector_store %arg6[%c0_21, %c0_22], %20 {strides = array<i32>} : memref<8x64xf32, #tpu.memory_space<vmem>>, vector<8x64xf32>,
      %c0_23 = arith.constant 0 : index
      %c0_24 = arith.constant 0 : index
      %22 = vector.load %arg9[%c0_23, %c0_24] : memref<8x64xf32, #tpu.memory_space<vmem>>, vector<8x64xf32>
      %c0_25 = arith.constant 0 : index
      %c0_26 = arith.constant 0 : index
      %23 = vector.load %arg7[%c0_25, %c0_26] : memref<8x64xf32, #tpu.memory_space<vmem>>, vector<8x64xf32>
      tpu.vector_store %arg7[%c0_25, %c0_26], %22 {strides = array<i32>} : memref<8x64xf32, #tpu.memory_space<vmem>>, vector<8x64xf32>,
    } else {
    }
    return
  }
  func.func @transform_0(%arg0: i32, %arg1: i32) -> (i32, i32) {
    %c0_i32 = arith.constant 0 : i32
    %c0_i32_0 = arith.constant 0 : i32
    return %arg1, %c0_i32 : i32, i32
  }
  func.func @transform_1(%arg0: i32, %arg1: i32) -> (i32, i32) {
    %c0_i32 = arith.constant 0 : i32
    %c0_i32_0 = arith.constant 0 : i32
    return %c0_i32, %arg0 : i32, i32
  }
  func.func @transform_2(%arg0: i32, %arg1: i32) -> (i32, i32) {
    %c0_i32 = arith.constant 0 : i32
    %c0_i32_0 = arith.constant 0 : i32
    return %c0_i32, %arg1 : i32, i32
  }
  func.func @transform_3(%arg0: i32, %arg1: i32) -> (i32, i32) {
    %c0_i32 = arith.constant 0 : i32
    return %arg1, %arg0 : i32, i32
  }
  func.func @transform_4(%arg0: i32, %arg1: i32) -> (i32, i32) {
    %c0_i32 = arith.constant 0 : i32
    %c0_i32_0 = arith.constant 0 : i32
    return %c0_i32, %arg0 : i32, i32
  }
  func.func @transform_5(%arg0: i32, %arg1: i32) -> (i32, i32) {
    %c0_i32 = arith.constant 0 : i32
    %c0_i32_0 = arith.constant 0 : i32
    return %c0_i32, %arg0 : i32, i32
  }
}

</mosaic_0001>

<bundles_post_ra>
// kernel: tpu_custom_call.1
= control target key start
LH: loop header
LB: loop body
LE: loop exit
PB: predicated region body
PF: predicated region fallthrough
CT: control target
= control target key end

     0   :  { %11 = vsyncpa [#allocation5], 0  ;;  %s2183_s0 = inlined_call_operand.hbm [shape: bf16[512,256], index: 0, kind: input, shape index: {}]   ;;  %s2184_s1 = inlined_call_operand.vmem [shape: bf16[256,64], index: 1, kind: input, shape index: {}]   ;;  %s2185_s2 = inlined_call_operand.vmem [shape: f32[8,512], index: 2, kind: input, shape index: {}]   ;;  %s2186_s3 = inlined_call_operand.vmem [shape: f32[512,64], index: 3, kind: output, shape index: {0}]   ;;  %s2187_s4 = inlined_call_operand.hbm [shape: f32[8,64], index: 4, kind: output, shape index: {1}]   ;;  %s2188_s5 = inlined_call_operand.hbm [shape: f32[8,64], index: 5, kind: output, shape index: {2}]  }
   0x1   :  { %13 = vsyncpa [#allocation5 + $0x1], 0 }
   0x2   :  { %14 = vsyncpa [#allocation6], 0 }
   0x3   :  { %15 = vsyncpa [#allocation9], 0  ;;  %s1686_s18 = smov 0   ;;  %s1688_s19 = smov 0  }
   0x4   :  { %s1690_s20 = smov 0   ;;  %s1692_s21 = smov 0  }
   0x5   :  { %s1694_s22 = smov 0   ;;  %s1696_s23 = smov 0  }
   0x6 LB: > { %s1152_s24 = sadd.s32 4294967295, %s1649_s23   ;;  %s30_s25 = sadd.s32 1, %s1645_s22  ;;  %s1649_s23 = sphi %s1696_s23, %s21_s23   ;;  %s1645_s22 = sphi %s1694_s22, %s2196_s22   ;;  %s1641_s21 = sphi %s1692_s21, %s2195_s21   ;;  %s1637_s20 = sphi %s1690_s20, %s2194_s20   ;;  %s1633_s19 = sphi %s1688_s19, %s2193_s19   ;;  %s1629_s18 = sphi %s1686_s18, %s2192_s18  }
   0x7   : > { %p31_p0 = scmp.ge.s32.totalorder %s30_s25, 2  ;;  %s40_s26 = sadd.s32 1, %s1637_s20 }
   0x8   : > { %p47_p1 = scmp.ne.s32.totalorder %s1637_s20, %s1633_s19  ;;  %p48_p2 = scmp.eq.s32.totalorder %s1649_s23, 0 }
   0x9   : > { %s2198_s25 = smov (%p31_p0, %s30_s25), 0  ;;  %p53_p4 = scmp.ne.s32.totalorder %s1633_s19, %s1629_s18 }
   0xa   : > { %p1722_p3 = por %p48_p2, %p47_p1  ;;  %s37_s28 = ssub.s32 %s1645_s22, %s2198_s25 }
   0xb   : > { %p54_p5 = scmp.eq.s32.totalorder %s1152_s24, 0  ;;  %p38_p6 = scmp.eq.s32.totalorder %s37_s28, 0 }
   0xc   : > { %p1447_p8 = scmp.lt.s32.totalorder %s1649_s23, 2  ;;  %s216_s6 = sand.u32 1, %s1637_s20  }
   0xd   : > { %p1731_p7 = por %p54_p5, %p53_p4  ;;  %s1368_s7 = sshll.u32 %s1645_s22, 8 }
   0xe   : > { %s1737_s30 = scalar_select %p38_p6, %s1637_s20, %s40_s26  }
   0xf   : > { %s1157_s8 = sshll.u32 %s216_s6, 8  ;;  %s226_s11 = scalar_lea.hbm %s2183_s0, %s1368_s7 }
  0x10   : > { %s227_s12 = sshll.u32 %s226_s11, 4  ;;  %s220_s13 = scalar_lea.vmem [#allocation4], %s1157_s8  ;;  %s228_s12 = int_to_ptr.hbm [resolvable:$true] %s227_s12 }
  0x11   : > { %s229_s14 = sshll.u32 %s220_s13, 4  ;;  %p1444_p9 = pnand %p1447_p8, %p1722_p3  ;;  %s230_s14 = int_to_ptr.vmem [resolvable:$true] %s229_s14 }
  0x12   : > { %p1161_p10 = scmp.ge.s32.totalorder %s1649_s23, 1  ;;  %p246_p11 = scmp.lt.s32.totalorder %s1649_s23, 3 }
  0x13   : > { %s217_s15 = scalar_lea.sflag [#allocation5], %s216_s6  ;;  %s1651_s16 = smov 128  }
  0x14   : > { %s1652_s17 = smov 8   ;;  %p247_p12 = pnand %p1161_p10, %p246_p11 }
  0x15   : > { %1446 = dma.hbm_to_vmem [thread:$0]  (!%p1444_p9), %s228_s12, 4096, %s230_s14, %s217_s15, %s1651_s16, %s1651_s16, %s1652_s17  }
  0x16   : > { %250 = sbr.rel (%p247_p12) target bundleno = 563 (0x233), region = 32  ;;  %s252_s18 = sand.u32 (!%p247_p12), 1, %s1633_s19  }
  0x17   : > { %s1162_s26 = sshll.u32 (!%p247_p12), %s252_s18, 8  ;;  %s253_s28 = scalar_lea.sflag (!%p247_p12), [#allocation5], %s252_s18 }
  0x18   : > { %s1749_s7 = scalar_lea.vmem (!%p247_p12), [#allocation4], %s1162_s26 }
  0x1b   : > { %1616 = dma.done.wait (%p1731_p7), %s253_s28, 4096  }
  0x1c   : > { %1618 = vsyncadd (%p1731_p7), %s253_s28, 4294963200  ;;  %s1163_s27 = sshll.u32 %s1641_s21, 1  ;;  %v1408_v0 = vld [vmem:[%s2184_s1 + $0x38] sm:$0xff]  ;;  %v1407_v2 = vld [vmem:[%s2184_s1 + $0x30] sm:$0xff]  ;;  %s1165_s13 = sshll.u32 %s1641_s21, 5  ;;  %vm814_vm0 = vcmask 523264  }
  0x1d   : > { %p302_p13 = scmp.lt.s32.totalorder %s1163_s27, 3  ;;  %v1416_v1 = vld [vmem:[%s2184_s1 + $0x78] sm:$0xff]  ;;  %636 = vmatpush.bf16.msra.mxu0 %v1408_v0  ;;  %v1415_v3 = vld [vmem:[%s2184_s1 + $0x70] sm:$0xff]  ;;  %1417 = vmatpush.bf16.msra.mxu2 %v1408_v0  ;;  %v1406_v4 = vld [vmem:[%s2184_s1 + $0x28] sm:$0xff]  ;;  %p308_p0 = scmp.lt.s32.totalorder %s1165_s13, 63 }
  0x1e   : > { %725 = vmatpush.bf16.msra.mxu1 %v1416_v1  ;;  %1425 = vmatpush.bf16.msra.mxu3 %v1416_v1  ;;  %v1414_v5 = vld [vmem:[%s2184_s1 + $0x68] sm:$0xff]  ;;  %v1405_v6 = vld [vmem:[%s2184_s1 + $0x20] sm:$0xff]  ;;  %v1404_v8 = vld [vmem:[%s2184_s1 + $0x18] sm:$0xff]  ;;  %p1359_p1 = scmp.ne.s32.totalorder %s1641_s21, 0 }
  0x1f   : > { %s2200_s27 = smov (!%p302_p13, %s1163_s27), 3  ;;  %v1413_v7 = vld [vmem:[%s2184_s1 + $0x60] sm:$0xff]  ;;  %v1412_v9 = vld [vmem:[%s2184_s1 + $0x58] sm:$0xff]  ;;  %v1403_v10 = vld [vmem:[%s2184_s1 + $0x10] sm:$0xff]  ;;  %s2202_s13 = smov (!%p308_p0, %s1165_s13), 63 }
  0x20   : > { %s1164_s6 = sshll.u32 %s2200_s27, 3  ;;  %v1411_v11 = vld [vmem:[%s2184_s1 + $0x50] sm:$0xff]  ;;  %v1402_v12 = vld [vmem:[%s2184_s1 + $0x8] sm:$0xff]  ;;  %v1401_v14 = vld [vmem:[%s2184_s1] sm:$0xff]  ;;  %s1166_s14 = sshll.u32 %s2202_s13, 3 }
  0x21   : > { %s1759_s10 = scalar_lea.vmem %s2185_s2, %s1164_s6  ;;  %637 = vmatpush.bf16.msra.mxu0 %v1407_v2  ;;  %1418 = vmatpush.bf16.msra.mxu2 %v1407_v2  ;;  %v1410_v13 = vld [vmem:[%s2184_s1 + $0x48] sm:$0xff]  ;;  %v1409_v15 = vld [vmem:[%s2184_s1 + $0x40] sm:$0xff]  ;;  %v1169_v16 = vld [vmem:[%s1749_s7] sm:$0xf]  ;;  %s1873_s16 = scalar_lea.vmem %s2186_s3, %s1166_s14 }
  0x22   : > { %726 = vmatpush.bf16.msra.mxu1 %v1415_v3  ;;  %1426 = vmatpush.bf16.msra.mxu3 %v1415_v3  ;;  %v1370_v17 = vld [vmem:[%s1749_s7 + $0x4] sm:$0xf0]  ;;  %v1369_v18 = vld [vmem:[%s1749_s7 + $0x4] sm:$0xf]  ;;  %v1171_v19 = vld [vmem:[%s1749_s7 + $0x8] sm:$0xf0] }
  0x23   : > { %v1170_v20 = vor.u32 %v1370_v17, %v1169_v16  ;;  %v1174_v21 = vor.u32 %v1369_v18, %v1171_v19  ;;  %v1177_v22 = vld [vmem:[%s1749_s7 + $0x10] sm:$0xf]  ;;  %v1372_v23 = vld [vmem:[%s1749_s7 + $0x14] sm:$0xf0]  ;;  %v1371_v24 = vld [vmem:[%s1749_s7 + $0x14] sm:$0xf] }
  0x24   : > { %v1179_v25 = vld [vmem:[%s1749_s7 + $0x18] sm:$0xf0]  ;;  %v1178_v26 = vor.u32 %v1372_v23, %v1177_v22  ;;  %v1249_v28 = vld [vmem:[%s1749_s7 + $0xa0] sm:$0xf]  ;;  %v1390_v29 = vld [vmem:[%s1749_s7 + $0xa4] sm:$0xf0] }
  0x25   : > { %638 = vmatpush.bf16.msra.mxu0 %v1406_v4  ;;  %1419 = vmatpush.bf16.msra.mxu2 %v1406_v4  ;;  %v1182_v27 = vor.u32 %v1371_v24, %v1179_v25  ;;  %v1389_v30 = vld [vmem:[%s1749_s7 + $0xa4] sm:$0xf]  ;;  %v1250_v31 = vor.u32 %v1390_v29, %v1249_v28  ;;  %v1251_v32 = vld [vmem:[%s1749_s7 + $0xa8] sm:$0xf0]  ;;  %v1185_v34 = vld [vmem:[%s1749_s7 + $0x20] sm:$0xf] }
  0x26   : > { %727 = vmatpush.bf16.msra.mxu1 %v1414_v5  ;;  %1427 = vmatpush.bf16.msra.mxu3 %v1414_v5  ;;  %v1254_v33 = vor.u32 %v1389_v30, %v1251_v32  ;;  %v1374_v35 = vld [vmem:[%s1749_s7 + $0x24] sm:$0xf0]  ;;  %v1373_v36 = vld [vmem:[%s1749_s7 + $0x24] sm:$0xf]  ;;  %v1187_v37 = vld [vmem:[%s1749_s7 + $0x28] sm:$0xf0] }
  0x27   : > { %v1186_v38 = vor.u32 %v1374_v35, %v1185_v34  ;;  %v1190_v39 = vor.u32 %v1373_v36, %v1187_v37  ;;  %v1257_v40 = vld [vmem:[%s1749_s7 + $0xb0] sm:$0xf]  ;;  %v1392_v41 = vld [vmem:[%s1749_s7 + $0xb4] sm:$0xf0]  ;;  %v1391_v42 = vld [vmem:[%s1749_s7 + $0xb4] sm:$0xf] }
  0x28   : > { %v1258_v43 = vor.u32 %v1392_v41, %v1257_v40  ;;  %v1259_v44 = vld [vmem:[%s1749_s7 + $0xb8] sm:$0xf0]  ;;  %v1193_v46 = vld [vmem:[%s1749_s7 + $0x30] sm:$0xf]  ;;  %v1376_v47 = vld [vmem:[%s1749_s7 + $0x34] sm:$0xf0] }
  0x29   : > { %639 = vmatpush.bf16.msra.mxu0 %v1405_v6  ;;  %1420 = vmatpush.bf16.msra.mxu2 %v1405_v6  ;;  %v1262_v45 = vor.u32 %v1391_v42, %v1259_v44  ;;  %v1375_v48 = vld [vmem:[%s1749_s7 + $0x34] sm:$0xf]  ;;  %v1195_v49 = vld [vmem:[%s1749_s7 + $0x38] sm:$0xf0]  ;;  %v1194_v50 = vor.u32 %v1376_v47, %v1193_v46  ;;  %v1265_v52 = vld [vmem:[%s1749_s7 + $0xc0] sm:$0xf] }
  0x2a   : > { %728 = vmatpush.bf16.msra.mxu1 %v1413_v7  ;;  %1428 = vmatpush.bf16.msra.mxu3 %v1413_v7  ;;  %v1198_v51 = vor.u32 %v1375_v48, %v1195_v49  ;;  %v1394_v53 = vld [vmem:[%s1749_s7 + $0xc4] sm:$0xf0]  ;;  %v1393_v54 = vld [vmem:[%s1749_s7 + $0xc4] sm:$0xf]  ;;  %v1267_v56 = vld [vmem:[%s1749_s7 + $0xc8] sm:$0xf0] }
  0x2b   : > { %v1266_v55 = vor.u32 %v1394_v53, %v1265_v52  ;;  %v1270_v57 = vor.u32 %v1393_v54, %v1267_v56  ;;  %v1201_v58 = vld [vmem:[%s1749_s7 + $0x40] sm:$0xf]  ;;  %v1378_v59 = vld [vmem:[%s1749_s7 + $0x44] sm:$0xf0]  ;;  %v1377_v60 = vld [vmem:[%s1749_s7 + $0x44] sm:$0xf] }
  0x2c   : > { %v1203_v61 = vld [vmem:[%s1749_s7 + $0x48] sm:$0xf0]  ;;  %v1202_v62 = vor.u32 %v1378_v59, %v1201_v58  ;;  %v1273_v0 = vld [vmem:[%s1749_s7 + $0xd0] sm:$0xf]  ;;  %v1396_v1 = vld [vmem:[%s1749_s7 + $0xd4] sm:$0xf0] }
  0x2d   : > { %640 = vmatpush.bf16.msra.mxu0 %v1404_v8  ;;  %1421 = vmatpush.bf16.msra.mxu2 %v1404_v8  ;;  %v1206_v63 = vor.u32 %v1377_v60, %v1203_v61  ;;  %v1395_v2 = vld [vmem:[%s1749_s7 + $0xd4] sm:$0xf]  ;;  %v1274_v3 = vor.u32 %v1396_v1, %v1273_v0  ;;  %v1275_v4 = vld [vmem:[%s1749_s7 + $0xd8] sm:$0xf0]  ;;  %v1209_v6 = vld [vmem:[%s1749_s7 + $0x50] sm:$0xf] }
  0x2e   : > { %729 = vmatpush.bf16.msra.mxu1 %v1412_v9  ;;  %1429 = vmatpush.bf16.msra.mxu3 %v1412_v9  ;;  %v1278_v5 = vor.u32 %v1395_v2, %v1275_v4  ;;  %v1380_v7 = vld [vmem:[%s1749_s7 + $0x54] sm:$0xf0]  ;;  %v1379_v8 = vld [vmem:[%s1749_s7 + $0x54] sm:$0xf]  ;;  %v1211_v9 = vld [vmem:[%s1749_s7 + $0x58] sm:$0xf0] }
  0x2f   : > { %v1283_v16 = vld [vmem:[%s1749_s7 + $0xe8] sm:$0xf0]  ;;  %v1217_v18 = vld [vmem:[%s1749_s7 + $0x60] sm:$0xf]  ;;  %v1382_v19 = vld [vmem:[%s1749_s7 + $0x64] sm:$0xf0] }
  0x30   : > { %v1218_v22 = vor.u32 %v1382_v19, %v1217_v18  ;;  %v1289_v24 = vld [vmem:[%s1749_s7 + $0xf0] sm:$0xf]  ;;  %v1400_v25 = vld [vmem:[%s1749_s7 + $0xf4] sm:$0xf0]  ;;  %v1291_v28 = vld [vmem:[%s1749_s7 + $0xf8] sm:$0xf0] }
  0x31   : > { %641 = vmatpush.bf16.msra.mxu0 %v1403_v10  ;;  %1422 = vmatpush.bf16.msra.mxu2 %v1403_v10  ;;  %v1210_v10 = vor.u32 %v1380_v7, %v1209_v6  ;;  %v1225_v30 = vld [vmem:[%s1749_s7 + $0x70] sm:$0xf]  ;;  %v1383_v32 = vld [vmem:[%s1749_s7 + $0x74] sm:$0xf]  ;;  %v1233_v36 = vld [vmem:[%s1749_s7 + $0x80] sm:$0xf] }
  0x32   : > { %730 = vmatpush.bf16.msra.mxu1 %v1411_v11  ;;  %1430 = vmatpush.bf16.msra.mxu3 %v1411_v11  ;;  %v1214_v11 = vor.u32 %v1379_v8, %v1211_v9  ;;  %v1386_v37 = vld [vmem:[%s1749_s7 + $0x84] sm:$0xf0]  ;;  %v1241_v48 = vld [vmem:[%s1749_s7 + $0x90] sm:$0xf]  ;;  %v1388_v49 = vld [vmem:[%s1749_s7 + $0x94] sm:$0xf0] }
  0x33   : > { %v1234_v40 = vor.u32 %v1386_v37, %v1233_v36  ;;  %v1242_v52 = vor.u32 %v1388_v49, %v1241_v48 }
  0x35   : > { %642 = vmatpush.bf16.msra.mxu0 %v1402_v12  ;;  %1423 = vmatpush.bf16.msra.mxu2 %v1402_v12  ;;  %v1281_v12 = vld [vmem:[%s1749_s7 + $0xe0] sm:$0xf] }
  0x36   : > { %731 = vmatpush.bf16.msra.mxu1 %v1410_v13  ;;  %1431 = vmatpush.bf16.msra.mxu3 %v1410_v13  ;;  %v1398_v13 = vld [vmem:[%s1749_s7 + $0xe4] sm:$0xf0] }
  0x39   : > { %643 = vmatpush.bf16.msra.mxu0 %v1401_v14  ;;  %1424 = vmatpush.bf16.msra.mxu2 %v1401_v14  ;;  %v1397_v14 = vld [vmem:[%s1749_s7 + $0xe4] sm:$0xf] }
  0x3a   : > { %732 = vmatpush.bf16.msra.mxu1 %v1409_v15  ;;  %1432 = vmatpush.bf16.msra.mxu3 %v1409_v15  ;;  %v1282_v15 = vor.u32 %v1398_v13, %v1281_v12  ;;  %v1286_v17 = vor.u32 %v1397_v14, %v1283_v16 }
  0x3c   : > { %644 = vmatmul.bf16.vlgmr.msra.gmra.mxu0 %v1170_v20  ;;  %694 = vmatmul.bf16.vlgmr.msra.gmra.mxu2 %v1250_v31  ;;  %v1381_v20 = vld [vmem:[%s1749_s7 + $0x64] sm:$0xf]  ;;  %v1384_v31 = vld [vmem:[%s1749_s7 + $0x74] sm:$0xf0] }
  0x3d   : > { %733 = vmatmul.bf16.vlgmr.msra.gmra.mxu1 %v1174_v21  ;;  %783 = vmatmul.bf16.vlgmr.msra.gmra.mxu3 %v1254_v33  ;;  %v1219_v21 = vld [vmem:[%s1749_s7 + $0x68] sm:$0xf0]  ;;  %v1227_v33 = vld [vmem:[%s1749_s7 + $0x78] sm:$0xf0]  ;;  %v1226_v34 = vor.u32 %v1384_v31, %v1225_v30 }
  0x3e   : > { %v1222_v23 = vor.u32 %v1381_v20, %v1219_v21  ;;  %v1230_v35 = vor.u32 %v1383_v32, %v1227_v33 }
  0x4c   : > { %649 = vmatmul.bf16.gmra.mxu0 %v1178_v26  ;;  %699 = vmatmul.bf16.gmra.mxu2 %v1258_v43  ;;  %v1399_v26 = vld [vmem:[%s1749_s7 + $0xf4] sm:$0xf] }
  0x4d   : > { %738 = vmatmul.bf16.gmra.mxu1 %v1182_v27  ;;  %788 = vmatmul.bf16.gmra.mxu3 %v1262_v45  ;;  %v1290_v27 = vor.u32 %v1400_v25, %v1289_v24  ;;  %v1294_v29 = vor.u32 %v1399_v26, %v1291_v28 }
  0x5c   : > { %654 = vmatmul.bf16.gmra.mxu0 %v1186_v38  ;;  %704 = vmatmul.bf16.gmra.mxu2 %v1266_v55  ;;  %v1385_v38 = vld [vmem:[%s1749_s7 + $0x84] sm:$0xf] }
  0x5d   : > { %743 = vmatmul.bf16.gmra.mxu1 %v1190_v39  ;;  %793 = vmatmul.bf16.gmra.mxu3 %v1270_v57  ;;  %v1235_v39 = vld [vmem:[%s1749_s7 + $0x88] sm:$0xf0] }
  0x5e   : > { %v1238_v41 = vor.u32 %v1385_v38, %v1235_v39 }
  0x6c   : > { %659 = vmatmul.bf16.gmra.mxu0 %v1194_v50  ;;  %709 = vmatmul.bf16.gmra.mxu2 %v1274_v3  ;;  %v1387_v50 = vld [vmem:[%s1749_s7 + $0x94] sm:$0xf] }
  0x6d   : > { %748 = vmatmul.bf16.gmra.mxu1 %v1198_v51  ;;  %798 = vmatmul.bf16.gmra.mxu3 %v1278_v5  ;;  %v1243_v51 = vld [vmem:[%s1749_s7 + $0x98] sm:$0xf0] }
  0x6e   : > { %v1246_v53 = vor.u32 %v1387_v50, %v1243_v51 }
  0x7c   : > { %664 = vmatmul.bf16.gmra.mxu0 %v1202_v62  ;;  %714 = vmatmul.bf16.gmra.mxu2 %v1282_v15 }
  0x7d   : > { %753 = vmatmul.bf16.gmra.mxu1 %v1206_v63  ;;  %803 = vmatmul.bf16.gmra.mxu3 %v1286_v17 }
  0x8c   : > { %669 = vmatmul.bf16.gmra.mxu0 %v1210_v10  ;;  %719 = vmatmul.bf16.gmra.mxu2 %v1290_v27 }
  0x8d   : > { %758 = vmatmul.bf16.gmra.mxu1 %v1214_v11  ;;  %808 = vmatmul.bf16.gmra.mxu3 %v1294_v29 }
  0x9c   : > { %674 = vmatmul.bf16.gmra.mxu0 %v1218_v22 }
  0x9d   : > { %763 = vmatmul.bf16.gmra.mxu1 %v1222_v23 }
  0xac   : > { %679 = vmatmul.bf16.gmra.mxu0 %v1226_v34 }
  0xad   : > { %768 = vmatmul.bf16.gmra.mxu1 %v1230_v35 }
  0xb9   : > { %v645_v42 = vpop.f32.mrf.mxu0 }
  0xba   : > { %v734_v43 = vpop.f32.mrf.mxu1 }
  0xbb   : > { %v1875_v44 = vadd.f32 %v734_v43, %v645_v42 }
  0xbc   : > { %684 = vmatmul.bf16.gmra.mxu0 %v1234_v40 }
  0xbd   : > { %815 = vst.msk [vmem:[%s1873_s16] sm:$0xff] %vm814_vm0, %v1875_v44  ;;  %773 = vmatmul.bf16.gmra.mxu1 %v1238_v41 }
  0xbf   : > { %v695_v60 = vpop.f32.mrf.mxu2 }
  0xc0   : > { %v784_v61 = vpop.f32.mrf.mxu3 }
  0xc1   : > { %v647_v45 = vpop.f32.mrf.mxu0  ;;  %v1899_v62 = vadd.f32 %v784_v61, %v695_v60 }
  0xc2   : > { %v736_v46 = vpop.f32.mrf.mxu1 }
  0xc3   : > { %v1880_v47 = vadd.f32 %v736_v46, %v647_v45  ;;  %835 = vst.msk [vmem:[%s1873_s16 + $0xa0] sm:$0xff] %vm814_vm0, %v1899_v62 }
  0xc5   : > { %816 = vst.msk [vmem:[%s1873_s16 + $0x8] sm:$0xff] %vm814_vm0, %v1880_v47 }
  0xc7   : > { %v697_v2 = vpop.f32.mrf.mxu2 }
  0xc8   : > { %v786_v3 = vpop.f32.mrf.mxu3 }
  0xc9   : > { %v650_v54 = vpop.f32.mrf.mxu0  ;;  %v1906_v4 = vadd.f32 %v786_v3, %v697_v2 }
  0xca   : > { %v739_v55 = vpop.f32.mrf.mxu1 }
  0xcb   : > { %v1889_v56 = vadd.f32 %v739_v55, %v650_v54  ;;  %836 = vst.msk [vmem:[%s1873_s16 + $0xa8] sm:$0xff] %vm814_vm0, %v1906_v4 }
  0xcc   : > { %689 = vmatmul.bf16.gmra.mxu0 %v1242_v52 }
  0xcd   : > { %817 = vst.msk [vmem:[%s1873_s16 + $0x10] sm:$0xff] %vm814_vm0, %v1889_v56  ;;  %778 = vmatmul.bf16.gmra.mxu1 %v1246_v53 }
  0xcf   : > { %v700_v8 = vpop.f32.mrf.mxu2 }
  0xd0   : > { %v789_v9 = vpop.f32.mrf.mxu3 }
  0xd1   : > { %v652_v57 = vpop.f32.mrf.mxu0  ;;  %v1919_v10 = vadd.f32 %v789_v9, %v700_v8 }
  0xd2   : > { %v741_v58 = vpop.f32.mrf.mxu1 }
  0xd3   : > { %v1894_v59 = vadd.f32 %v741_v58, %v652_v57  ;;  %837 = vst.msk [vmem:[%s1873_s16 + $0xb0] sm:$0xff] %vm814_vm0, %v1919_v10 }
  0xd5   : > { %818 = vst.msk [vmem:[%s1873_s16 + $0x18] sm:$0xff] %vm814_vm0, %v1894_v59 }
  0xd7   : > { %v702_v14 = vpop.f32.mrf.mxu2 }
  0xd8   : > { %v791_v15 = vpop.f32.mrf.mxu3 }
  0xd9   : > { %v655_v63 = vpop.f32.mrf.mxu0  ;;  %v1926_v16 = vadd.f32 %v791_v15, %v702_v14 }
  0xda   : > { %v744_v0 = vpop.f32.mrf.mxu1 }
  0xdb   : > { %v1904_v1 = vadd.f32 %v744_v0, %v655_v63  ;;  %838 = vst.msk [vmem:[%s1873_s16 + $0xb8] sm:$0xff] %vm814_vm0, %v1926_v16 }
  0xdd   : > { %819 = vst.msk [vmem:[%s1873_s16 + $0x20] sm:$0xff] %vm814_vm0, %v1904_v1 }
  0xdf   : > { %v705_v20 = vpop.f32.mrf.mxu2 }
  0xe0   : > { %v794_v21 = vpop.f32.mrf.mxu3 }
  0xe1   : > { %v657_v5 = vpop.f32.mrf.mxu0  ;;  %v1939_v22 = vadd.f32 %v794_v21, %v705_v20 }
  0xe2   : > { %v746_v6 = vpop.f32.mrf.mxu1 }
  0xe3   : > { %v1914_v7 = vadd.f32 %v746_v6, %v657_v5  ;;  %839 = vst.msk [vmem:[%s1873_s16 + $0xc0] sm:$0xff] %vm814_vm0, %v1939_v22 }
  0xe5   : > { %820 = vst.msk [vmem:[%s1873_s16 + $0x28] sm:$0xff] %vm814_vm0, %v1914_v7 }
  0xe7   : > { %v707_v26 = vpop.f32.mrf.mxu2 }
  0xe8   : > { %v796_v27 = vpop.f32.mrf.mxu3 }
  0xe9   : > { %v660_v11 = vpop.f32.mrf.mxu0  ;;  %v1946_v28 = vadd.f32 %v796_v27, %v707_v26 }
  0xea   : > { %v749_v12 = vpop.f32.mrf.mxu1 }
  0xeb   : > { %v1924_v13 = vadd.f32 %v749_v12, %v660_v11  ;;  %840 = vst.msk [vmem:[%s1873_s16 + $0xc8] sm:$0xff] %vm814_vm0, %v1946_v28 }
  0xed   : > { %821 = vst.msk [vmem:[%s1873_s16 + $0x30] sm:$0xff] %vm814_vm0, %v1924_v13 }
  0xef   : > { %v710_v32 = vpop.f32.mrf.mxu2 }
  0xf0   : > { %v799_v33 = vpop.f32.mrf.mxu3 }
  0xf1   : > { %v662_v17 = vpop.f32.mrf.mxu0  ;;  %v1959_v34 = vadd.f32 %v799_v33, %v710_v32 }
  0xf2   : > { %v751_v18 = vpop.f32.mrf.mxu1 }
  0xf3   : > { %v1934_v19 = vadd.f32 %v751_v18, %v662_v17  ;;  %841 = vst.msk [vmem:[%s1873_s16 + $0xd0] sm:$0xff] %vm814_vm0, %v1959_v34 }
  0xf5   : > { %822 = vst.msk [vmem:[%s1873_s16 + $0x38] sm:$0xff] %vm814_vm0, %v1934_v19 }
  0xf7   : > { %v712_v38 = vpop.f32.mrf.mxu2 }
  0xf8   : > { %v801_v39 = vpop.f32.mrf.mxu3 }
  0xf9   : > { %v665_v23 = vpop.f32.mrf.mxu0  ;;  %v1966_v40 = vadd.f32 %v801_v39, %v712_v38 }
  0xfa   : > { %v754_v24 = vpop.f32.mrf.mxu1 }
  0xfb   : > { %v1944_v25 = vadd.f32 %v754_v24, %v665_v23  ;;  %842 = vst.msk [vmem:[%s1873_s16 + $0xd8] sm:$0xff] %vm814_vm0, %v1966_v40 }
  0xfd   : > { %823 = vst.msk [vmem:[%s1873_s16 + $0x40] sm:$0xff] %vm814_vm0, %v1944_v25 }
  0xff   : > { %v715_v45 = vpop.f32.mrf.mxu2 }
 0x100   : > { %v804_v46 = vpop.f32.mrf.mxu3 }
 0x101   : > { %v667_v29 = vpop.f32.mrf.mxu0  ;;  %v1979_v48 = vadd.f32 %v804_v46, %v715_v45 }
 0x102   : > { %v756_v30 = vpop.f32.mrf.mxu1 }
 0x103   : > { %v1954_v31 = vadd.f32 %v756_v30, %v667_v29  ;;  %843 = vst.msk [vmem:[%s1873_s16 + $0xe0] sm:$0xff] %vm814_vm0, %v1979_v48 }
 0x105   : > { %824 = vst.msk [vmem:[%s1873_s16 + $0x48] sm:$0xff] %vm814_vm0, %v1954_v31 }
 0x107   : > { %v717_v52 = vpop.f32.mrf.mxu2 }
 0x108   : > { %v806_v53 = vpop.f32.mrf.mxu3 }
 0x109   : > { %v670_v35 = vpop.f32.mrf.mxu0  ;;  %v1986_v54 = vadd.f32 %v806_v53, %v717_v52 }
 0x10a   : > { %v759_v36 = vpop.f32.mrf.mxu1 }
 0x10b   : > { %v1964_v37 = vadd.f32 %v759_v36, %v670_v35  ;;  %844 = vst.msk [vmem:[%s1873_s16 + $0xe8] sm:$0xff] %vm814_vm0, %v1986_v54 }
 0x10d   : > { %825 = vst.msk [vmem:[%s1873_s16 + $0x50] sm:$0xff] %vm814_vm0, %v1964_v37 }
 0x10f   : > { %v720_v60 = vpop.f32.mrf.mxu2 }
 0x110   : > { %v809_v61 = vpop.f32.mrf.mxu3 }
 0x111   : > { %v672_v41 = vpop.f32.mrf.mxu0  ;;  %v1999_v63 = vadd.f32 %v809_v61, %v720_v60 }
 0x112   : > { %v761_v42 = vpop.f32.mrf.mxu1 }
 0x113   : > { %v1974_v43 = vadd.f32 %v761_v42, %v672_v41  ;;  %845 = vst.msk [vmem:[%s1873_s16 + $0xf0] sm:$0xff] %vm814_vm0, %v1999_v63 }
 0x115   : > { %826 = vst.msk [vmem:[%s1873_s16 + $0x58] sm:$0xff] %vm814_vm0, %v1974_v43 }
 0x117   : > { %v722_v5 = vpop.f32.mrf.mxu2 }
 0x118   : > { %v811_v6 = vpop.f32.mrf.mxu3 }
 0x119   : > { %v675_v49 = vpop.f32.mrf.mxu0  ;;  %v812_v8 = vadd.f32 %v811_v6, %v722_v5 }
 0x11a   : > { %v764_v50 = vpop.f32.mrf.mxu1 }
 0x11b   : > { %v1984_v51 = vadd.f32 %v764_v50, %v675_v49  ;;  %846 = vst.msk [vmem:[%s1873_s16 + $0xf8] sm:$0xff] %vm814_vm0, %v812_v8 }
 0x11d   : > { %827 = vst.msk [vmem:[%s1873_s16 + $0x60] sm:$0xff] %vm814_vm0, %v1984_v51 }
 0x121   : > { %v677_v55 = vpop.f32.mrf.mxu0 }
 0x122   : > { %v766_v57 = vpop.f32.mrf.mxu1 }
 0x123   : > { %v1994_v58 = vadd.f32 %v766_v57, %v677_v55 }
 0x125   : > { %828 = vst.msk [vmem:[%s1873_s16 + $0x68] sm:$0xff] %vm814_vm0, %v1994_v58 }
 0x129   : > { %v680_v0 = vpop.f32.mrf.mxu0 }
 0x12a   : > { %v769_v2 = vpop.f32.mrf.mxu1 }
 0x12b   : > { %v2004_v3 = vadd.f32 %v769_v2, %v680_v0 }
 0x12d   : > { %829 = vst.msk [vmem:[%s1873_s16 + $0x70] sm:$0xff] %vm814_vm0, %v2004_v3 }
 0x131   : > { %v682_v9 = vpop.f32.mrf.mxu0 }
 0x132   : > { %v771_v11 = vpop.f32.mrf.mxu1 }
 0x133   : > { %v772_v12 = vadd.f32 %v771_v11, %v682_v9 }
 0x135   : > { %830 = vst.msk [vmem:[%s1873_s16 + $0x78] sm:$0xff] %vm814_vm0, %v772_v12 }
 0x139   : > { %v685_v14 = vpop.f32.mrf.mxu0 }
 0x13a   : > { %v774_v15 = vpop.f32.mrf.mxu1 }
 0x13b   : > { %v2013_v17 = vadd.f32 %v774_v15, %v685_v14 }
 0x13d   : > { %831 = vst.msk [vmem:[%s1873_s16 + $0x80] sm:$0xff] %vm814_vm0, %v2013_v17 }
 0x141   : > { %v687_v18 = vpop.f32.mrf.mxu0 }
 0x142   : > { %v776_v20 = vpop.f32.mrf.mxu1 }
 0x143   : > { %v2018_v21 = vadd.f32 %v776_v20, %v687_v18 }
 0x145   : > { %832 = vst.msk [vmem:[%s1873_s16 + $0x88] sm:$0xff] %vm814_vm0, %v2018_v21 }
 0x149   : > { %v690_v23 = vpop.f32.mrf.mxu0 }
 0x14a   : > { %v779_v24 = vpop.f32.mrf.mxu1 }
 0x14b   : > { %v2023_v26 = vadd.f32 %v779_v24, %v690_v23 }
 0x14d   : > { %833 = vst.msk [vmem:[%s1873_s16 + $0x90] sm:$0xff] %vm814_vm0, %v2023_v26 }
 0x151   : > { %v692_v27 = vpop.f32.mrf.mxu0  ;;  %850 = sbr.rel (%p1359_p1) target bundleno = 345 (0x159), region = 40 }
 0x152   : > { %v781_v29 = vpop.f32.mrf.mxu1 }
 0x153   : > { %v2028_v30 = vadd.f32 %v781_v29, %v692_v27 }
 0x155   : > { %834 = vst.msk [vmem:[%s1873_s16 + $0x98] sm:$0xff] %vm814_vm0, %v2028_v30 }
 0x156   : > { %v1653_v32 = vmov 0.0  }
 0x157   : > { %851 = vst.msk [vmem:[#allocation2] sm:$0xff] %vm814_vm0, %v1653_v32 }
 0x158   : > { %852 = vst.msk [vmem:[#allocation3] sm:$0xff] %vm814_vm0, %v1653_v32 }
 0x159 PF: > { %856 = vmatpush.msrb.mxu2 %v772_v12  ;;  %876 = vmatpush.msrb.mxu3 %v812_v8  ;;  %v914_v33 = vmul.f32 %v772_v12, %v772_v12  ;;  %v930_v35 = vmul.f32 %v812_v8, %v812_v8  ;;  %v913_v36 = vmul.f32 %v2004_v3, %v2004_v3  ;;  %v2069_v39 = vld [vmem:[%s1759_s10] sm:$0xff]  ;;  %v2072_v41 = vld [vmem:[%s1759_s10 + $0x8] sm:$0xff]  ;;  %p1360_p2 = scmp.ne.s32.totalorder %s1641_s21, 1 }
 0x15a   : > { %v929_v38 = vmul.f32 %v1999_v63, %v1999_v63  ;;  %v912_v42 = vmul.f32 %v1994_v58, %v1994_v58  ;;  %v928_v45 = vmul.f32 %v1986_v54, %v1986_v54  ;;  %v911_v46 = vmul.f32 %v1984_v51, %v1984_v51 }
 0x15b   : > { %857 = vmatpush.msrb.mxu2 %v2004_v3  ;;  %877 = vmatpush.msrb.mxu3 %v1999_v63  ;;  %v927_v49 = vmul.f32 %v1979_v48, %v1979_v48  ;;  %v910_v50 = vmul.f32 %v1974_v43, %v1974_v43  ;;  %v926_v52 = vmul.f32 %v1966_v40, %v1966_v40 }
 0x15c   : > { %v909_v53 = vmul.f32 %v1964_v37, %v1964_v37  ;;  %v915_v55 = vmul.f32 %v2013_v17, %v2013_v17 }
 0x15d   : > { %858 = vmatpush.msrb.mxu2 %v1994_v58  ;;  %878 = vmatpush.msrb.mxu3 %v1986_v54  ;;  %v925_v54 = vmul.f32 %v1959_v34, %v1959_v34 }
 0x15f   : > { %859 = vmatpush.msrb.mxu2 %v1984_v51  ;;  %879 = vmatpush.msrb.mxu3 %v1979_v48  ;;  %v908_v48 = vmul.f32 %v1954_v31, %v1954_v31  ;;  %v924_v51 = vmul.f32 %v1946_v28, %v1946_v28 }
 0x161   : > { %860 = vmatpush.msrb.mxu2 %v1974_v43  ;;  %880 = vmatpush.msrb.mxu3 %v1966_v40  ;;  %v907_v40 = vmul.f32 %v1944_v25, %v1944_v25  ;;  %v923_v43 = vmul.f32 %v1939_v22, %v1939_v22 }
 0x163   : > { %861 = vmatpush.msrb.mxu2 %v1964_v37  ;;  %881 = vmatpush.msrb.mxu3 %v1959_v34  ;;  %v906_v34 = vmul.f32 %v1934_v19, %v1934_v19  ;;  %v922_v37 = vmul.f32 %v1926_v16, %v1926_v16 }
 0x165   : > { %862 = vmatpush.msrb.mxu2 %v1954_v31  ;;  %882 = vmatpush.msrb.mxu3 %v1946_v28  ;;  %v905_v28 = vmul.f32 %v1924_v13, %v1924_v13  ;;  %v921_v31 = vmul.f32 %v1919_v10, %v1919_v10 }
 0x167   : > { %863 = vmatpush.msrb.mxu2 %v1944_v25  ;;  %883 = vmatpush.msrb.mxu3 %v1939_v22  ;;  %v904_v22 = vmul.f32 %v1914_v7, %v1914_v7  ;;  %v920_v25 = vmul.f32 %v1906_v4, %v1906_v4 }
 0x169   : > { %864 = vmatpush.msrb.mxu2 %v1934_v19  ;;  %884 = vmatpush.msrb.mxu3 %v1926_v16  ;;  %v903_v16 = vmul.f32 %v1904_v1, %v1904_v1  ;;  %v919_v19 = vmul.f32 %v1899_v62, %v1899_v62 }
 0x16b   : > { %865 = vmatpush.msrb.mxu2 %v1924_v13  ;;  %885 = vmatpush.msrb.mxu3 %v1919_v10  ;;  %v902_v10 = vmul.f32 %v1894_v59, %v1894_v59  ;;  %v918_v13 = vmul.f32 %v2028_v30, %v2028_v30 }
 0x16d   : > { %866 = vmatpush.msrb.mxu2 %v1914_v7  ;;  %886 = vmatpush.msrb.mxu3 %v1906_v4  ;;  %v901_v4 = vmul.f32 %v1889_v56, %v1889_v56  ;;  %v917_v7 = vmul.f32 %v2023_v26, %v2023_v26 }
 0x16f   : > { %867 = vmatpush.msrb.mxu2 %v1904_v1  ;;  %887 = vmatpush.msrb.mxu3 %v1899_v62  ;;  %v900_v62 = vmul.f32 %v1880_v47, %v1880_v47  ;;  %v916_v1 = vmul.f32 %v2018_v21, %v2018_v21 }
 0x171   : > { %868 = vmatpush.msrb.mxu2 %v1894_v59  ;;  %888 = vmatpush.msrb.mxu3 %v2028_v30  ;;  %v899_v59 = vmul.f32 %v1875_v44, %v1875_v44 }
 0x173   : > { %869 = vmatpush.msrb.mxu2 %v1889_v56  ;;  %889 = vmatpush.msrb.mxu3 %v2023_v26  ;;  %v855_v56 = vld [vmem:[#allocation2] sm:$0xff] }
 0x175   : > { %870 = vmatpush.msrb.mxu2 %v1880_v47  ;;  %890 = vmatpush.msrb.mxu3 %v2018_v21 }
 0x177   : > { %871 = vmatpush.msrb.mxu2 %v1875_v44  ;;  %891 = vmatpush.msrb.mxu3 %v2013_v17  ;;  %v898_v44 = vld [vmem:[#allocation3] sm:$0xff] }
 0x178   : > { %872 = vmatmul.f32.vlgmr.msrb.gmra.mxu2 %v2069_v39  ;;  %892 = vmatmul.f32.vlgmr.msrb.gmra.mxu3 %v2072_v41 }
 0x179   : > { %931 = vmatpush.msra.mxu2 %v914_v33  ;;  %951 = vmatpush.msra.mxu3 %v930_v35 }
 0x17b   : > { %932 = vmatpush.msra.mxu2 %v913_v36  ;;  %952 = vmatpush.msra.mxu3 %v929_v38 }
 0x17d   : > { %933 = vmatpush.msra.mxu2 %v912_v42  ;;  %953 = vmatpush.msra.mxu3 %v928_v45 }
 0x17f   : > { %934 = vmatpush.msra.mxu2 %v911_v46  ;;  %954 = vmatpush.msra.mxu3 %v927_v49 }
 0x181   : > { %935 = vmatpush.msra.mxu2 %v910_v50  ;;  %955 = vmatpush.msra.mxu3 %v926_v52 }
 0x183   : > { %936 = vmatpush.msra.mxu2 %v909_v53  ;;  %956 = vmatpush.msra.mxu3 %v925_v54 }
 0x185   : > { %937 = vmatpush.msra.mxu2 %v908_v48  ;;  %957 = vmatpush.msra.mxu3 %v924_v51 }
 0x187   : > { %938 = vmatpush.msra.mxu2 %v907_v40  ;;  %958 = vmatpush.msra.mxu3 %v923_v43 }
 0x189   : > { %939 = vmatpush.msra.mxu2 %v906_v34  ;;  %959 = vmatpush.msra.mxu3 %v922_v37 }
 0x18b   : > { %940 = vmatpush.msra.mxu2 %v905_v28  ;;  %960 = vmatpush.msra.mxu3 %v921_v31 }
 0x18d   : > { %941 = vmatpush.msra.mxu2 %v904_v22  ;;  %961 = vmatpush.msra.mxu3 %v920_v25 }
 0x18f   : > { %942 = vmatpush.msra.mxu2 %v903_v16  ;;  %962 = vmatpush.msra.mxu3 %v919_v19 }
 0x191   : > { %943 = vmatpush.msra.mxu2 %v902_v10  ;;  %963 = vmatpush.msra.mxu3 %v918_v13 }
 0x193   : > { %944 = vmatpush.msra.mxu2 %v901_v4  ;;  %964 = vmatpush.msra.mxu3 %v917_v7 }
 0x195   : > { %945 = vmatpush.msra.mxu2 %v900_v62  ;;  %965 = vmatpush.msra.mxu3 %v916_v1 }
 0x197   : > { %946 = vmatpush.msra.mxu2 %v899_v59  ;;  %966 = vmatpush.msra.mxu3 %v915_v55 }
 0x198   : > { %947 = vmatmul.f32.vlgmr.msra.gmra.mxu2 %v2069_v39  ;;  %967 = vmatmul.f32.vlgmr.msra.gmra.mxu3 %v2072_v41 }
 0x1fb   : > { %v873_v47 = vpop.f32.mrf.mxu2  ;;  %v893_v57 = vpop.f32.mrf.mxu3 }
 0x1fc   : > { %v894_v58 = vadd.f32 %v893_v57, %v873_v47 }
 0x1fe   : > { %v896_v60 = vadd.f32 %v894_v58, %v855_v56 }
 0x200   : > { %897 = vst.msk [vmem:[#allocation2] sm:$0xff] %vm814_vm0, %v896_v60 }
 0x21b   : > { %v948_v61 = vpop.f32.mrf.mxu2  ;;  %v968_v63 = vpop.f32.mrf.mxu3 }
 0x21c   : > { %v969_v0 = vadd.f32 %v968_v63, %v948_v61  ;;  %976 = sbr.rel (%p1360_p2) target bundleno = 553 (0x229), region = 44 }
 0x21e   : > { %v971_v2 = vadd.f32 %v969_v0, %v898_v44 }
 0x220   : > { %972 = vst.msk [vmem:[#allocation3] sm:$0xff] %vm814_vm0, %v971_v2 }
 0x221   : > { %v977_v3 = vld [vmem:[#allocation2] sm:$0xff] }
 0x222   : > { %978 = vst.msk [vmem:[#allocation7] sm:$0xff] %vm814_vm0, %v977_v3 }
 0x227   : > { %v979_v5 = vld [vmem:[#allocation3] sm:$0xff] }
 0x228   : > { %980 = vst.msk [vmem:[#allocation8] sm:$0xff] %vm814_vm0, %v979_v5 }
 0x229 PF: > { %p2143_p3 = scmp.eq.s32.totalorder %s1152_s24, 1  ;;  %s1003_s21 = sshll.u32 %s2187_s4, 4  ;;  %s1004_s21 = int_to_ptr.hbm [resolvable:$true] %s1003_s21 }
 0x22a   : > { %s1654_s18 = smov [#allocation7]   ;;  %s1655_s28 = smov [#allocation8]  }
 0x22b   : > { %s1001_s26 = sshll.u32 %s1654_s18, 4  ;;  %s1015_s27 = sshll.u32 %s1655_s28, 4  ;;  %s1002_s26 = int_to_ptr.vmem [resolvable:$true] %s1001_s26  ;;  %s1016_s27 = int_to_ptr.vmem [resolvable:$true] %s1015_s27 }
 0x22c   : > { %1436 = dma.vmem_to_hbm [thread:$0]  (%p2143_p3), %s1002_s26, 128, %s1004_s21, [#allocation6]  }
 0x22d   : > { %s1017_s8 = sshll.u32 %s2188_s5, 4  ;;  %s1018_s8 = int_to_ptr.hbm [resolvable:$true] %s1017_s8 }
 0x22e   : > { %1438 = dma.vmem_to_hbm [thread:$0]  (%p2143_p3), %s1016_s27, 128, %s1018_s8, [#allocation9]  }
 0x22f   : > { %1620 = dma.done.wait (%p2143_p3), [#allocation6], 128  }
 0x230   : > { %1622 = vsyncadd (%p2143_p3), [#allocation6], 4294967168 }
 0x231   : > { %1624 = dma.done.wait (%p2143_p3), [#allocation9], 128  }
 0x232   : > { %1626 = vsyncadd (%p2143_p3), [#allocation9], 4294967168 }
 0x233 PF: > { %s21_s23 = sadd.s32 1, %s1649_s23   ;;  %s2192_s18 = smov %s1633_s19 }
 0x234   : > { %p18_p4 = scmp.ge.s32.totalorder %s21_s23, 4   ;;  %s2193_s19 = smov %s1637_s20 }
 0x235   : > { %s2194_s20 = smov %s1737_s30  ;;  %s2195_s21 = smov %s1645_s22 }
 0x236   : > { %s2196_s22 = smov %s2198_s25  ;;  %20 = sbr.rel (!%p18_p4) target bundleno = 6 (0x6), region = 105 }
 0x23b   :  { %1047 = vsyncpa [#allocation5], 1 }
 0x23c   :  { %1049 = vsyncpa [#allocation5 + $0x1], 1 }
 0x23d   :  { %1050 = vsyncpa [#allocation6], 1 }
 0x23e   :  { %1052 = vsyncpa [#allocation6 + $0x1], 1 }
 0x23f   :  { %1053 = vsyncpa [#allocation9], 1 }

</bundles_post_ra>
